<compile_context>
chip_gen: v7x
topology: tpu7x:2x2x1
jax: 0.10.0
libtpu: 0.0.40
codegen_flags: <defaults>
</compile_context>

<pallas_src>
import jax
import jax.numpy as jnp
from jax.experimental import pallas as pl
from jax.experimental.pallas import tpu as pltpu

_LANE = 128


def _fused_permute_linear_relu_kernel(x_ref, w_ref, b_ref, o_ref):
    # x_ref: (C, TS)  slab of the un-permuted (B, C, S) activation (B squeezed)
    # w_ref: (N, C)   PyTorch Linear weight layout, used without any transpose
    # b_ref: (N, 1)   bias as a column so it broadcasts along the lane (S) axis
    # o_ref: (N, TS)  transposed output tile -> lane-dense stores
    y = jnp.dot(w_ref[...], x_ref[...], preferred_element_type=jnp.float32)
    y = y + b_ref[...]                       # bias broadcast over lanes
    o_ref[...] = jnp.maximum(y, 0.0).astype(o_ref.dtype)


def _pick_s_tile(S):
    """Pad S up to a lane multiple (if needed) and pick the largest tile in
    {2048,...,128} dividing the padded extent. S < 128 uses one full-extent
    block (allowed: block dim equals the full array dim)."""
    if S < _LANE:
        return S, S
    Sp = pl.cdiv(S, _LANE) * _LANE
    for ts in (2048, 1024, 512, 256, 128):
        if Sp % ts == 0:
            return Sp, ts
    return Sp, _LANE  # unreachable: Sp is a multiple of 128


def model_forward(x1, weight, bias):
    """relu(linear(permute(x1, (0, 2, 1)), W, b)).reshape(-1)  (PyTorch semantics)."""
    B, C, S = x1.shape
    N, C_w = weight.shape
    assert C == C_w, (C, C_w)

    Sp, TS = _pick_s_tile(S)
    x_in = x1 if Sp == S else jnp.pad(x1, ((0, 0), (0, 0), (0, Sp - S)))
    bias_col = bias.reshape(N, 1)

    grid = (B, Sp // TS)
    out_t = pl.pallas_call(
        _fused_permute_linear_relu_kernel,
        out_shape=jax.ShapeDtypeStruct((B, N, Sp), jnp.float32),
        grid=grid,
        in_specs=[
            # (1, C, TS) slab of the un-permuted activation; B dim squeezed.
            pl.BlockSpec((None, C, TS), lambda b, s: (b, 0, s)),
            # Weight / bias: grid-invariant, kept resident in VMEM.
            pl.BlockSpec((N, C), lambda b, s: (0, 0)),
            pl.BlockSpec((N, 1), lambda b, s: (0, 0)),
        ],
        out_specs=pl.BlockSpec((None, N, TS), lambda b, s: (b, 0, s)),
        compiler_params=pltpu.CompilerParams(
            dimension_semantics=("parallel", "parallel")),
    )(x_in, weight, bias_col)

    # out_t is (B, N, Sp) = per-batch transposed output. Drop S padding and
    # restore PyTorch's (B, S, N) element order for the final flatten. The
    # output is tiny (out_features == 2), so this reorder is cheap plain-XLA glue.
    out = jnp.transpose(out_t[:, :, :S], (0, 2, 1))
    return out.reshape(-1)


if __name__ == "__main__":
    key = jax.random.PRNGKey(0)
    kx, kw, kb = jax.random.split(key, 3)

    in_features, out_features = 2, 2          # nn.Linear(2, 2) from the module
    B, S = 2, 256                             # small (B, C=2, S) input

    # Deterministic init mimicking torch.nn.Linear default: U(-1/sqrt(in), 1/sqrt(in))
    bound = 1.0 / jnp.sqrt(jnp.float32(in_features))
    weight = jax.random.uniform(kw, (out_features, in_features),
                                minval=-bound, maxval=bound, dtype=jnp.float32)
    bias = jax.random.uniform(kb, (out_features,),
                              minval=-bound, maxval=bound, dtype=jnp.float32)
    x1 = jax.random.normal(kx, (B, in_features, S), dtype=jnp.float32)

    fwd = jax.jit(model_forward)
    out = fwd(x1, weight, bias)
    jax.block_until_ready(out)

    # Plain-JAX reference with identical semantics to the PyTorch module.
    ref = jnp.maximum(
        jnp.einsum("bcs,nc->bsn", x1, weight) + bias, 0.0
    ).reshape(-1)

    assert out.shape == (B * S * out_features,), out.shape
    assert jnp.allclose(out, ref, atol=1e-5, rtol=1e-5), \
        float(jnp.max(jnp.abs(out - ref)))
    print("KERNEL_OK")
</pallas_src>

<mosaic_0001>
module attributes {stable_mosaic.version = 11 : i64} {
  func.func @_fused_permute_linear_relu_kernel(%arg0: i32, %arg1: i32, %arg2: memref<1x2x256xf32, #tpu.memory_space<vmem>>, %arg3: memref<2x2xf32, #tpu.memory_space<vmem>>, %arg4: memref<2x1xf32, #tpu.memory_space<vmem>>, %arg5: memref<1x2x256xf32, #tpu.memory_space<vmem>>) attributes {dimension_semantics = [#tpu.dimension_semantics<parallel>, #tpu.dimension_semantics<parallel>], iteration_bounds = array<i64: 2, 1>, scalar_prefetch = 0 : i64, scratch_operands = 0 : i64, tpu.core_type = #tpu.core_type<tc>, window_params = [{transform_indices = @transform_0, window_bounds = array<i64: 1, 2, 256>}, {pipeline_mode = #tpu.pipeline_mode<synchronous>, transform_indices = @transform_1, window_bounds = array<i64: 2, 2>}, {pipeline_mode = #tpu.pipeline_mode<synchronous>, transform_indices = @transform_2, window_bounds = array<i64: 2, 1>}, {transform_indices = @transform_3, window_bounds = array<i64: 1, 2, 256>}]} {
    %c0 = arith.constant 0 : index
    %c0_0 = arith.constant 0 : index
    %0 = vector.load %arg3[%c0, %c0_0] : memref<2x2xf32, #tpu.memory_space<vmem>>, vector<2x2xf32>
    %c0_1 = arith.constant 0 : index
    %c0_2 = arith.constant 0 : index
    %c0_3 = arith.constant 0 : index
    %1 = vector.load %arg2[%c0_1, %c0_2, %c0_3] : memref<1x2x256xf32, #tpu.memory_space<vmem>>, vector<1x2x256xf32>
    %2 = vector.shape_cast %1 : vector<1x2x256xf32> to vector<2x256xf32>
    %cst = arith.constant dense<0.000000e+00> : vector<2x256xf32>
    %3 = tpu.matmul %0, %2, %cst {dimension_numbers = #tpu.dot_dimension_numbers<[1], [0], [0], [1], [0, 0, 1, 1], [], []>} : vector<2x2xf32>, vector<2x256xf32>, vector<2x256xf32> -> vector<2x256xf32>
    %c0_4 = arith.constant 0 : index
    %c0_5 = arith.constant 0 : index
    %4 = vector.load %arg4[%c0_4, %c0_5] : memref<2x1xf32, #tpu.memory_space<vmem>>, vector<2x1xf32>
    %5 = vector.broadcast %4 : vector<2x1xf32> to vector<2x256xf32>
    %6 = arith.addf %3, %5 : vector<2x256xf32>
    %cst_6 = arith.constant 0.000000e+00 : f32
    %7 = vector.broadcast %cst_6 : f32 to vector<2x256xf32>
    %8 = arith.maximumf %6, %7 : vector<2x256xf32>
    %c0_7 = arith.constant 0 : index
    %c0_8 = arith.constant 0 : index
    %c0_9 = arith.constant 0 : index
    %9 = vector.load %arg5[%c0_7, %c0_8, %c0_9] : memref<1x2x256xf32, #tpu.memory_space<vmem>>, vector<1x2x256xf32>
    %10 = vector.shape_cast %9 : vector<1x2x256xf32> to vector<2x256xf32>
    %11 = vector.shape_cast %8 : vector<2x256xf32> to vector<1x2x256xf32>
    tpu.vector_store %arg5[%c0_7, %c0_8, %c0_9], %11 {strides = array<i32>} : memref<1x2x256xf32, #tpu.memory_space<vmem>>, vector<1x2x256xf32>,
    return
  }
  func.func @transform_0(%arg0: i32, %arg1: i32) -> (i32, i32, i32) {
    %c0_i32 = arith.constant 0 : i32
    %c0_i32_0 = arith.constant 0 : i32
    return %arg0, %c0_i32, %arg1 : i32, i32, i32
  }
  func.func @transform_1(%arg0: i32, %arg1: i32) -> (i32, i32) {
    %c0_i32 = arith.constant 0 : i32
    %c0_i32_0 = arith.constant 0 : i32
    %c0_i32_1 = arith.constant 0 : i32
    return %c0_i32, %c0_i32_0 : i32, i32
  }
  func.func @transform_2(%arg0: i32, %arg1: i32) -> (i32, i32) {
    %c0_i32 = arith.constant 0 : i32
    %c0_i32_0 = arith.constant 0 : i32
    %c0_i32_1 = arith.constant 0 : i32
    return %c0_i32, %c0_i32_0 : i32, i32
  }
  func.func @transform_3(%arg0: i32, %arg1: i32) -> (i32, i32, i32) {
    %c0_i32 = arith.constant 0 : i32
    %c0_i32_0 = arith.constant 0 : i32
    return %arg0, %c0_i32, %arg1 : i32, i32, i32
  }
}

</mosaic_0001>

<bundles_post_ra>
// kernel: model_forward.1
= control target key start
LH: loop header
LB: loop body
LE: loop exit
PB: predicated region body
PF: predicated region fallthrough
CT: control target
= control target key end

     0   :  { %8 = vsyncpa [#allocation3], 0  ;;  %s737_s0 = inlined_call_operand.hbm [shape: f32[2,2,256], index: 0, kind: input, shape index: {}]   ;;  %s738_s1 = inlined_call_operand.vmem [shape: f32[2,2], index: 1, kind: input, shape index: {}]   ;;  %s739_s2 = inlined_call_operand.vmem [shape: f32[2,1], index: 2, kind: input, shape index: {}]   ;;  %s740_s3 = inlined_call_operand.vmem [shape: f32[2,2,256], index: 3, kind: output, shape index: {}]  }
   0x1   :  { %10 = vsyncpa [#allocation3 + $0x1], 0  ;;  %s606_s12 = smov 0   ;;  %s608_s13 = smov 0  }
   0x2   :  { %s610_s14 = smov 0   ;;  %s612_s15 = smov 0  }
   0x3   :  { %s614_s16 = smov 0   ;;  %s616_s17 = smov 0  }
   0x4 LB: > { %s423_s18 = sadd.s32 4294967295, %s581_s17   ;;  %s28_s19 = sadd.s32 1, %s577_s16  ;;  %s581_s17 = sphi %s616_s17, %s16_s17   ;;  %s577_s16 = sphi %s614_s16, %s750_s16   ;;  %s573_s15 = sphi %s612_s15, %s749_s15   ;;  %s569_s14 = sphi %s610_s14, %s748_s14   ;;  %s565_s13 = sphi %s608_s13, %s747_s13   ;;  %s561_s12 = sphi %s606_s12, %s746_s12  }
   0x5   : > { %p30_p0 = scmp.ge.s32.totalorder %s28_s19, 2  ;;  %s37_s20 = sadd.s32 1, %s569_s14 }
   0x6   : > { %p44_p1 = scmp.ne.s32.totalorder %s569_s14, %s565_s13  ;;  %p45_p2 = scmp.eq.s32.totalorder %s581_s17, 0 }
   0x7   : > { %s752_s19 = smov (%p30_p0, %s28_s19), 0  ;;  %p50_p4 = scmp.ne.s32.totalorder %s565_s13, %s561_s12 }
   0x8   : > { %p642_p3 = por %p45_p2, %p44_p1  ;;  %s32_s22 = ssub.s32 %s577_s16, %s752_s19 }
   0x9   : > { %p51_p5 = scmp.eq.s32.totalorder %s423_s18, 0  ;;  %p35_p6 = scmp.eq.s32.totalorder %s32_s22, 0 }
   0xa   : > { %p449_p8 = scmp.lt.s32.totalorder %s581_s17, 2  ;;  %s150_s25 = sand.u32 1, %s569_s14  }
   0xb   : > { %p649_p7 = por %p51_p5, %p50_p4  ;;  %s441_s26 = sshll.u32 %s577_s16, 6 }
   0xc   : > { %s655_s24 = scalar_select %p35_p6, %s569_s14, %s37_s20  }
   0xd   : > { %s427_s27 = sshll.u32 %s150_s25, 2  ;;  %s662_s30 = scalar_lea.hbm %s737_s0, %s441_s26 }
   0xe   : > { %s154_s4 = scalar_lea.vmem [#allocation2], %s427_s27  ;;  %p666_p9 = pnand %p449_p8, %p642_p3 }
   0xf   : > { %s164_s5 = sshll.u32 %s154_s4, 4  ;;  %s151_s7 = scalar_lea.sflag [#allocation3], %s150_s25  ;;  %s670_s5 = int_to_ptr.vmem [resolvable:$true] %s164_s5 }
  0x10   : > { %s501_s8 = scalar_lea.hbm %s662_s30, 64  ;;  %p503_p13 = pneg %p666_p9 }
  0x11   : > { %p502_p12 = scmp.ne.s32.totalorder %s662_s30, %s501_s8  ;;  %s506_s11 = scalar_lea.hbm %s737_s0, 128 }
  0x12   : > { %p507_p2 = scmp.lt.u32.totalorder %s662_s30, %s737_s0  ;;  %p508_p3 = scmp.lt.u32.totalorder %s506_s11, %s501_s8 }
  0x13   : > { %p504_p0 = pnand %p503_p13, %p502_p12  ;;  %p510_p5 = scmp.lt.u32.totalorder %s501_s8, %s662_s30 }
  0x14   : > { %p509_p4 = por %p508_p3, %p507_p2 }
  0x15   : > { %p505_p1 = pneg %p504_p0 }
  0x16   : > { %p511_p6 = por %p510_p5, %p509_p4 }
  0x18   : > { %p512_p8 = pnand %p511_p6, %p505_p1 }
  0x1a   : > { %515 = shalt.err (!%p512_p8)
}
  0x1b   : > { %s516_s20 = scalar_lea.vmem %s670_s5, 64  ;;  %s583_s21 = smov [#allocation2]  }
  0x1c   : > { %p517_p12 = scmp.ne.s32.totalorder %s670_s5, %s516_s20  ;;  %s521_s22 = sshll.u32 %s583_s21, 4  ;;  %s522_s22 = int_to_ptr.vmem [resolvable:$false] %s521_s22 }
  0x1d   : > { %s523_s25 = scalar_lea.vmem %s522_s22, 128  ;;  %p524_p11 = scmp.lt.s32.totalorder %s670_s5, %s522_s22 }
  0x1e   : > { %p519_p0 = pnand %p517_p12, %p503_p13  ;;  %p525_p2 = scmp.lt.s32.totalorder %s523_s25, %s516_s20 }
  0x20   : > { %p520_p10 = pneg %p519_p0  ;;  %p526_p3 = por %p525_p2, %p524_p11 }
  0x22   : > { %p527_p4 = pnand %p526_p3, %p520_p10 }
  0x24   : > { %530 = shalt.err (!%p527_p4)
}
  0x25   : > { %448 = dma.hbm_to_vmem [thread:$0]  (!%p666_p9), %s662_s30, 64, %s670_s5, %s151_s7  }
  0x26   : > { %p744_p1 = scmp.lt.s32.totalorder %s581_s17, 3  ;;  %p745_p5 = scmp.ge.s32.totalorder %s581_s17, 1 }
  0x28   : > { %p170_p13 = pnand %p745_p5, %p744_p1 }
  0x29   : > { %s175_s26 = sand.u32 (!%p170_p13), 1, %s565_s13  }
  0x2a   : > { %173 = sbr.rel (%p170_p13) target bundleno = 276 (0x114), region = 32  ;;  %s431_s27 = sshll.u32 (!%p170_p13), %s175_s26, 2 }
  0x2b   : > { %s176_s28 = scalar_lea.sflag (!%p170_p13), [#allocation3], %s175_s26  ;;  %s179_s29 = scalar_lea.vmem (!%p170_p13), [#allocation2], %s431_s27 }
  0x31   : > { %556 = dma.done.wait (%p649_p7), %s176_s28, 64  }
  0x32   : > { %558 = vsyncadd (%p649_p7), %s176_s28, 4294967232  ;;  %v584_v0 = vmov 0.0   ;;  %v585_v1 = vmov 0   ;;  %vm238_vm0 = vcmask 1041408   ;;  %v219_v4 = vld [vmem:[%s739_s2] sm:$0x3] }
  0x33   : > { %307 = vmatprep.mubr.f32.mxu0 %v584_v0  ;;  %500 = vset.pattern.permute.xlu0 %v585_v1  ;;  %v434_v2 = vld.sshfl [vmem:[%s179_s29] sm:$0x33 pattern:$0x76325410]  ;;  %vm234_vm1 = vcmask 15360   ;;  %p208_p7 = scmp.lt.s32.totalorder %s573_s15, 1 }
  0x34   : > { %v233_v3 = vcombine.high %v434_v2, %v434_v2  ;;  %v217_v5 = vld [vmem:[%s738_s1] sm:$0x3]  ;;  %222 = vperm.xlu0 %500, %v219_v4  }
  0x35   : > { %s754_s15 = smov (!%p208_p7, %s573_s15), 1 }
  0x36   : > { %435 = vmatprep.subr.msk.mxu0 %vm238_vm0, %v233_v3  ;;  %s442_s23 = sshll.u32 %s754_s15, 2 }
  0x37   : > { %436 = vmatpush1.msk.msra.mxu0 %vm238_vm0, %v434_v2  ;;  %s215_s9 = scalar_lea.vmem %s740_s3, %s442_s23 }
  0x38   : > { %437 = vmatmul.mubr.msk.f32.vlgmr.msra.gmra.mrb[0].mxu0 %vm234_vm1, %v217_v5 }
  0xb3   : > { %v223_v6 = vpop.permute.xlu0 %222 }
 0x10b   : > { %v309_v7 = vpop.f32.mrb[0].mxu0 }
 0x10c   : > { %v310_v8 = vadd.f32 %v309_v7, %v223_v6  ;;  %v311_v9 = vpop.f32.mrb[1].mxu0 }
 0x10d   : > { %v312_v10 = vadd.f32 %v311_v9, %v223_v6 }
 0x10e   : > { %v314_v11 = vmax.f32 %v310_v8, 0.0 }
 0x10f   : > { %v315_v12 = vmax.f32 %v312_v10, 0.0 }
 0x111   : > { %v318_v13 = vcombine.low %v314_v11, %v315_v12 }
 0x113   : > { %438 = vst.sshfl [vmem:[%s215_s9] sm:$0x33 pattern:$0x76325410] %v318_v13 }
 0x114 PF: > { %s16_s17 = sadd.s32 1, %s581_s17   ;;  %s746_s12 = smov %s565_s13 }
 0x115   : > { %p13_p9 = scmp.ge.s32.totalorder %s16_s17, 4   ;;  %s747_s13 = smov %s569_s14 }
 0x116   : > { %s748_s14 = smov %s655_s24  ;;  %s749_s15 = smov %s577_s16 }
 0x117   : > { %s750_s16 = smov %s752_s19  ;;  %15 = sbr.rel (!%p13_p9) target bundleno = 4 (0x4), region = 72 }
 0x11e   :  { %358 = vsyncpa [#allocation3], 1 }
 0x11f   :  { %360 = vsyncpa [#allocation3 + $0x1], 1 }

</bundles_post_ra>
